<compile_context>
chip_gen: v7x
topology: tpu7x:2x2x1
jax: 0.10.0
libtpu: 0.0.40
codegen_flags: <defaults>
</compile_context>

<pallas_src>
import functools

import jax
import jax.numpy as jnp
import numpy as np
from jax.experimental import pallas as pl
from jax.experimental.pallas import tpu as pltpu

HEADS = 2
DIM_HEAD = 16
INNER = HEADS * DIM_HEAD
NEG = -1e30  # plain Python float literal (no captured jnp constants in the kernel)


# ----------------------------- Pallas kernel --------------------------------
def _attn_kernel(x_ref, c_ref, mask_ref, cmask_ref, wq_ref, wkv_ref, wo_ref,
                 o_ref, *, m, n):
    """One grid step processes `bt` batch elements.

    x_ref    : (bt*m, d)    queries   (batch folded into rows wrapper-side)
    c_ref    : (bt*n, d)    context
    mask_ref : (bt, m, 1)   query mask   (float 0/1)
    cmask_ref: (bt, 1, n)   context mask (float 0/1)
    wq_ref   : (d, INNER)   Q weight (softmax scale pre-folded)
    wkv_ref  : (d, 2*INNER) fused K|V weight
    wo_ref   : (INNER, d)   output projection
    o_ref    : (bt*m, d)
    """
    bm, d = x_ref.shape
    bt = bm // m
    mm_dtype = x_ref.dtype          # matmul operand dtype (f32 or bf16); acc is f32

    # Projections as two large (rows, d) matmuls -> good MXU streaming.
    q = jnp.dot(x_ref[...], wq_ref[...], preferred_element_type=jnp.float32)
    kv = jnp.dot(c_ref[...], wkv_ref[...], preferred_element_type=jnp.float32)
    q = q.reshape(bt, m, INNER)
    kv = kv.reshape(bt, n, 2 * INNER)

    # Combined mask formed IN-KERNEL from the two small mask blocks (no (b,m,n)
    # tensor ever touches HBM).  Broadcast mul rides spare VPU slots.
    allowed = (mask_ref[...] * cmask_ref[...]) > 0.5            # (bt, m, n) bool

    head_outs = []
    for h in range(HEADS):                                      # static unroll (HEADS==2)
        lo = h * DIM_HEAD
        qh = q[:, :, lo:lo + DIM_HEAD].astype(mm_dtype)                  # (bt, m, E)
        kh = kv[:, :, lo:lo + DIM_HEAD].astype(mm_dtype)                 # (bt, n, E)
        vh = kv[:, :, INNER + lo:INNER + lo + DIM_HEAD].astype(mm_dtype)  # (bt, n, E)

        # Batched contraction over E -- no explicit transpose of K.
        s = jnp.einsum('bme,bne->bmn', qh, kh,
                       preferred_element_type=jnp.float32)      # (bt, m, n) f32
        s = jnp.where(allowed, s, NEG)                          # masked_fill semantics
        s = s - jnp.max(s, axis=-1, keepdims=True)
        p = jnp.exp(s)
        # Exact normalization (the approx reciprocal caused the previous mismatch).
        p = p / jnp.sum(p, axis=-1, keepdims=True)

        head_outs.append(jnp.einsum('bmn,bne->bme', p.astype(mm_dtype), vh,
                                    preferred_element_type=jnp.float32))

    # Single K=INNER output projection (heads concatenated on the lane axis)
    # instead of two K=DIM_HEAD dots + a VPU accumulate.
    o_cat = jnp.concatenate(head_outs, axis=-1).reshape(bm, INNER).astype(mm_dtype)
    o_ref[...] = jnp.dot(o_cat, wo_ref[...],
                         preferred_element_type=jnp.float32).astype(o_ref.dtype)


# --------------------------- block-size heuristics ---------------------------
def _num_tensorcores():
    """2 on v7x-class parts (2 TC/chip), else 1 (v5e / v6e / interpret fallback)."""
    try:
        kind = jax.devices()[0].device_kind.lower()
    except Exception:
        return 1
    return 2 if ("v7" in kind or kind.startswith("tpu7")) else 1


def _pick_block_b(b, m, n, d, in_itemsize, *, vmem_budget_bytes=8 << 20):
    """Batch elements per grid step, derived from a VMEM budget + TensorCore count.

    One grid step per TensorCore when VMEM allows: single step on 1-TC v5e/v6e
    (avoids ~0.35us/step overhead), >=2 "parallel" steps on 2-TC v7x so both cores
    get work.  The 8 MiB default budget is conservative enough for v7x's smaller
    (64 MiB physical / 32 MiB scoped) VMEM without touching vmem_limit_bytes.
    """
    per_b = (2 * in_itemsize * (m * d + n * d)        # x, c tiles (double-buffered)
             + 2 * 4 * (m + n)                        # mask tiles
             + 2 * in_itemsize * m * d                # output tile (double-buffered)
             + 4 * (m * INNER + n * 2 * INNER         # q, kv f32 intermediates
                    + 2 * m * n                       # mask + score/prob tile
                    + m * INNER))                     # head outputs
    bt = max(1, min(b, vmem_budget_bytes // max(per_b, 1)))
    bt = min(bt, pl.cdiv(b, _num_tensorcores()))
    while bt > 1 and b % bt != 0:
        bt -= 1
    return bt


# ------------------------------- attention op --------------------------------
def attention_pallas(x, c, mask, context_mask, params, *,
                     matmul_dtype=jnp.float32, vmem_budget_bytes=8 << 20):
    """x: (b,m,d) queries, c: (b,n,d) context, masks boolean (b,m)/(b,n).

    matmul_dtype=jnp.bfloat16 uses bf16 MXU operands (f32 accumulation and f32
    mask/softmax math) -- the preferred setting on v6e/v7x.
    """
    b, m, d = x.shape
    n = c.shape[1]
    out_dtype = x.dtype
    wq, wk, wv, wo = params

    scale = float(DIM_HEAD) ** -0.5
    wq_s = (wq * scale).astype(matmul_dtype)                    # fold scale into Wq
    wkv = jnp.concatenate([wk, wv], axis=1).astype(matmul_dtype)  # fused K|V weight
    wo_c = wo.astype(matmul_dtype)

    # Wrapper-side (metadata-only) reshapes: 2-D row slabs for the kernel.
    x2 = x.reshape(b * m, d).astype(matmul_dtype)
    c2 = c.reshape(b * n, d).astype(matmul_dtype)
    mask_f = mask.astype(jnp.float32).reshape(b, m, 1)
    cmask_f = context_mask.astype(jnp.float32).reshape(b, 1, n)

    in_itemsize = jnp.dtype(matmul_dtype).itemsize
    bt = _pick_block_b(b, m, n, d, in_itemsize, vmem_budget_bytes=vmem_budget_bytes)
    grid = (b // bt,)

    flops = 2 * b * (m * d * INNER + n * d * 2 * INNER
                     + 2 * HEADS * m * n * DIM_HEAD + m * INNER * d)
    bytes_accessed = (x2.size * in_itemsize + c2.size * in_itemsize
                      + 4 * (mask_f.size + cmask_f.size)
                      + in_itemsize * (wq_s.size + wkv.size + wo_c.size)
                      + b * m * d * jnp.dtype(out_dtype).itemsize)

    kernel = functools.partial(_attn_kernel, m=m, n=n)

    out = pl.pallas_call(
        kernel,
        out_shape=jax.ShapeDtypeStruct((b * m, d), out_dtype),
        grid=grid,
        in_specs=[
            pl.BlockSpec((bt * m, d), lambda i: (i, 0)),
            pl.BlockSpec((bt * n, d), lambda i: (i, 0)),
            pl.BlockSpec((bt, m, 1), lambda i: (i, 0, 0)),
            pl.BlockSpec((bt, 1, n), lambda i: (i, 0, 0)),
            pl.BlockSpec((d, INNER), lambda i: (0, 0)),
            pl.BlockSpec((d, 2 * INNER), lambda i: (0, 0)),
            pl.BlockSpec((INNER, d), lambda i: (0, 0)),
        ],
        out_specs=pl.BlockSpec((bt * m, d), lambda i: (i, 0)),
        compiler_params=pltpu.CompilerParams(
            dimension_semantics=("parallel",)),
        cost_estimate=pl.CostEstimate(
            flops=flops,
            transcendentals=b * HEADS * m * n,
            bytes_accessed=bytes_accessed),
    )(x2, c2, mask_f, cmask_f, wq_s, wkv, wo_c)
    # TODO(synk): a lane-dense (b, m*d) output presentation (unmasked full-lane vst)
    # is a secondary lever; the in-kernel sublane->lane fold needs measuring first.
    return out.reshape(b, m, d)


# --------------------- InterceptAttention forward (glue) --------------------
def intercept_attention(x_flat, c, params, *, shape, slice_tuple,
                        mask=None, context_mask=None, context=False,
                        context_shape=None, matmul_dtype=jnp.float32):
    b, d = shape[0], shape[-1]

    if context:
        # slice the context instead of the sequence
        c_full = c.reshape(context_shape)
        c_sub = c_full[slice_tuple]
        c_use = c_sub.reshape(b, -1, d)
        if context_mask is not None:
            context_mask = context_mask.reshape(context_shape[:-1])[slice_tuple].reshape(b, -1)
        else:
            context_mask = jnp.ones(c_use.shape[:2], dtype=bool)
        if mask is None:
            mask = jnp.ones(x_flat.shape[:2], dtype=bool)
        return attention_pallas(x_flat, c_use, mask, context_mask, params,
                                matmul_dtype=matmul_dtype)

    # ---- context == False path: slice the sequence, scatter back into zeros ----
    x_full = x_flat.reshape(shape)                 # (b, H, W, d)
    output = jnp.zeros_like(x_full)
    x_sub = x_full[slice_tuple]                    # (b, h_sub, W, d)
    subset_shape = x_sub.shape
    x_s = x_sub.reshape(b, -1, d)                  # (b, m, d)
    m = x_s.shape[1]

    if mask is not None:
        mask_s = mask.reshape(shape[:-1])[slice_tuple].reshape(b, m)
    else:
        mask_s = jnp.ones((b, m), dtype=bool)
    if context_mask is None:
        context_mask = jnp.ones((b, c.shape[1]), dtype=bool)

    attn_out = attention_pallas(x_s, c, mask_s, context_mask, params,
                                matmul_dtype=matmul_dtype)      # (b, m, d)
    output = output.at[slice_tuple].set(attn_out.reshape(subset_shape).astype(output.dtype))
    return output.reshape(b, -1, d)


# ----------------------------- pure-JAX reference ---------------------------
def ref_attention(x, c, mask, context_mask, params, *, matmul_dtype=jnp.float32):
    """Mirrors the kernel's operand-dtype choices so bf16 comparisons are fair."""
    wq, wk, wv, wo = params
    b, m, d = x.shape
    n = c.shape[1]
    scale = float(DIM_HEAD) ** -0.5

    wq_s = (wq * scale).astype(matmul_dtype)
    wk_c = wk.astype(matmul_dtype)
    wv_c = wv.astype(matmul_dtype)
    wo_c = wo.astype(matmul_dtype)
    xm = x.astype(matmul_dtype)
    cm = c.astype(matmul_dtype)

    q = jnp.einsum('bmd,de->bme', xm, wq_s, preferred_element_type=jnp.float32)
    k = jnp.einsum('bnd,de->bne', cm, wk_c, preferred_element_type=jnp.float32)
    v = jnp.einsum('bnd,de->bne', cm, wv_c, preferred_element_type=jnp.float32)
    q = q.reshape(b, m, HEADS, DIM_HEAD)
    k = k.reshape(b, n, HEADS, DIM_HEAD)
    v = v.reshape(b, n, HEADS, DIM_HEAD)

    s = jnp.einsum('bihe,bjhe->bhij', q.astype(matmul_dtype), k.astype(matmul_dtype),
                   preferred_element_type=jnp.float32)
    pair = mask[:, None, :, None] & context_mask[:, None, None, :]
    s = jnp.where(pair, s, NEG)
    p = jax.nn.softmax(s, axis=-1)
    o = jnp.einsum('bhij,bjhe->bihe', p.astype(matmul_dtype), v.astype(matmul_dtype),
                   preferred_element_type=jnp.float32)
    o = o.reshape(b, m, INNER).astype(matmul_dtype)
    return jnp.einsum('bme,ed->bmd', o, wo_c,
                      preferred_element_type=jnp.float32).astype(x.dtype)


def ref_intercept_attention(x_flat, c, params, *, shape, slice_tuple, mask,
                            context_mask, matmul_dtype=jnp.float32):
    b, d = shape[0], shape[-1]
    x_full = x_flat.reshape(shape)
    x_sub = x_full[slice_tuple]
    subset_shape = x_sub.shape
    xs = x_sub.reshape(b, -1, d)
    m = xs.shape[1]
    ms = mask.reshape(shape[:-1])[slice_tuple].reshape(b, m)

    o = ref_attention(xs, c, ms, context_mask, params, matmul_dtype=matmul_dtype)

    output = jnp.zeros(shape, x_flat.dtype)
    output = output.at[slice_tuple].set(o.reshape(subset_shape))
    return output.reshape(b, -1, d)


# ---------------------------------- main -------------------------------------
if __name__ == "__main__":
    key = jax.random.PRNGKey(0)
    k1, k2, k3, k4, k5, k6 = jax.random.split(key, 6)

    B, H, W, D = 2, 4, 4, 32        # full sequence is an H x W grid of D-dim tokens
    N_CTX = 8
    shape = (B, H, W, D)
    slice_tuple = (slice(None), slice(0, 2))   # take the first 2 rows -> m = 2*W = 8

    x_flat = jax.random.normal(k1, (B, H * W, D), dtype=jnp.float32)
    c = jax.random.normal(k2, (B, N_CTX, D), dtype=jnp.float32)

    # deterministic parameter init (shapes from a standard Attention module)
    wq = jax.random.normal(k3, (D, INNER), dtype=jnp.float32) / np.sqrt(D)
    wk = jax.random.normal(k4, (D, INNER), dtype=jnp.float32) / np.sqrt(D)
    wv = jax.random.normal(k5, (D, INNER), dtype=jnp.float32) / np.sqrt(D)
    wo = jax.random.normal(k6, (INNER, D), dtype=jnp.float32) / np.sqrt(INNER)
    params = (wq, wk, wv, wo)

    # boolean masks with some False entries to exercise masked softmax
    mask = (jnp.arange(H * W).reshape(1, H * W) % 7 != 3).repeat(B, axis=0)          # (B, H*W)
    context_mask = (jnp.arange(N_CTX).reshape(1, N_CTX) % 5 != 4).repeat(B, axis=0)  # (B, N_CTX)

    # ---- exact f32 path ----
    out = intercept_attention(x_flat, c, params, shape=shape, slice_tuple=slice_tuple,
                              mask=mask, context_mask=context_mask, context=False)
    out = jax.block_until_ready(out)
    ref = ref_intercept_attention(x_flat, c, params, shape=shape, slice_tuple=slice_tuple,
                                  mask=mask, context_mask=context_mask)
    ref = jax.block_until_ready(ref)
    assert out.shape == (B, H * W, D)
    np.testing.assert_allclose(np.asarray(out), np.asarray(ref), rtol=1e-3, atol=1e-3)

    # ---- bf16 MXU-operand path (v6e/v7x preferred); compared against a reference
    #      that mirrors the same operand rounding, so only accumulation-order differs.
    out_bf = intercept_attention(x_flat, c, params, shape=shape, slice_tuple=slice_tuple,
                                 mask=mask, context_mask=context_mask, context=False,
                                 matmul_dtype=jnp.bfloat16)
    out_bf = jax.block_until_ready(out_bf)
    ref_bf = ref_intercept_attention(x_flat, c, params, shape=shape, slice_tuple=slice_tuple,
                                     mask=mask, context_mask=context_mask,
                                     matmul_dtype=jnp.bfloat16)
    ref_bf = jax.block_until_ready(ref_bf)
    np.testing.assert_allclose(np.asarray(out_bf), np.asarray(ref_bf), rtol=2e-2, atol=2e-2)

    # TODO(synk): the `attn` callable in the PyTorch module is injected; here a standard
    # multi-head cross-attention (q from sliced x, k/v from context) is used as the kernel.
    print("KERNEL_OK")
</pallas_src>

<mosaic_0001>
module attributes {stable_mosaic.version = 11 : i64} {
  func.func @_attn_kernel(%arg0: i32, %arg1: memref<16x32xf32, #tpu.memory_space<vmem>>, %arg2: memref<16x32xf32, #tpu.memory_space<vmem>>, %arg3: memref<2x8x1xf32, #tpu.memory_space<vmem>>, %arg4: memref<2x1x8xf32, #tpu.memory_space<vmem>>, %arg5: memref<32x32xf32, #tpu.memory_space<vmem>>, %arg6: memref<32x64xf32, #tpu.memory_space<vmem>>, %arg7: memref<32x32xf32, #tpu.memory_space<vmem>>, %arg8: memref<16x32xf32, #tpu.memory_space<vmem>>) attributes {dimension_semantics = [#tpu.dimension_semantics<parallel>], iteration_bounds = array<i64: 1>, scalar_prefetch = 0 : i64, scratch_operands = 0 : i64, tpu.core_type = #tpu.core_type<tc>, window_params = [{transform_indices = @transform_0, window_bounds = array<i64: 16, 32>}, {transform_indices = @transform_1, window_bounds = array<i64: 16, 32>}, {transform_indices = @transform_2, window_bounds = array<i64: 2, 8, 1>}, {transform_indices = @transform_3, window_bounds = array<i64: 2, 1, 8>}, {pipeline_mode = #tpu.pipeline_mode<synchronous>, transform_indices = @transform_4, window_bounds = array<i64: 32, 32>}, {pipeline_mode = #tpu.pipeline_mode<synchronous>, transform_indices = @transform_5, window_bounds = array<i64: 32, 64>}, {pipeline_mode = #tpu.pipeline_mode<synchronous>, transform_indices = @transform_6, window_bounds = array<i64: 32, 32>}, {transform_indices = @transform_7, window_bounds = array<i64: 16, 32>}]} {
    %c0 = arith.constant 0 : index
    %c0_0 = arith.constant 0 : index
    %0 = vector.load %arg1[%c0, %c0_0] : memref<16x32xf32, #tpu.memory_space<vmem>>, vector<16x32xf32>
    %c0_1 = arith.constant 0 : index
    %c0_2 = arith.constant 0 : index
    %1 = vector.load %arg5[%c0_1, %c0_2] : memref<32x32xf32, #tpu.memory_space<vmem>>, vector<32x32xf32>
    %cst = arith.constant dense<0.000000e+00> : vector<16x32xf32>
    %2 = tpu.matmul %0, %1, %cst {dimension_numbers = #tpu.dot_dimension_numbers<[1], [0], [0], [1], [0, 0, 1, 1], [], []>} : vector<16x32xf32>, vector<32x32xf32>, vector<16x32xf32> -> vector<16x32xf32>
    %c0_3 = arith.constant 0 : index
    %c0_4 = arith.constant 0 : index
    %3 = vector.load %arg2[%c0_3, %c0_4] : memref<16x32xf32, #tpu.memory_space<vmem>>, vector<16x32xf32>
    %c0_5 = arith.constant 0 : index
    %c0_6 = arith.constant 0 : index
    %4 = vector.load %arg6[%c0_5, %c0_6] : memref<32x64xf32, #tpu.memory_space<vmem>>, vector<32x64xf32>
    %cst_7 = arith.constant dense<0.000000e+00> : vector<16x64xf32>
    %5 = tpu.matmul %3, %4, %cst_7 {dimension_numbers = #tpu.dot_dimension_numbers<[1], [0], [0], [1], [0, 0, 1, 1], [], []>} : vector<16x32xf32>, vector<32x64xf32>, vector<16x64xf32> -> vector<16x64xf32>
    %6 = vector.shape_cast %2 : vector<16x32xf32> to vector<2x8x32xf32>
    %7 = vector.shape_cast %5 : vector<16x64xf32> to vector<2x8x64xf32>
    %c0_8 = arith.constant 0 : index
    %c0_9 = arith.constant 0 : index
    %c0_10 = arith.constant 0 : index
    %8 = vector.load %arg3[%c0_8, %c0_9, %c0_10] : memref<2x8x1xf32, #tpu.memory_space<vmem>>, vector<2x8x1xf32>
    %c0_11 = arith.constant 0 : index
    %c0_12 = arith.constant 0 : index
    %c0_13 = arith.constant 0 : index
    %9 = vector.load %arg4[%c0_11, %c0_12, %c0_13] : memref<2x1x8xf32, #tpu.memory_space<vmem>>, vector<2x1x8xf32>
    %10 = vector.broadcast %8 : vector<2x8x1xf32> to vector<2x8x8xf32>
    %11 = vector.broadcast %9 : vector<2x1x8xf32> to vector<2x8x8xf32>
    %12 = arith.mulf %10, %11 : vector<2x8x8xf32>
    %cst_14 = arith.constant 5.000000e-01 : f32
    %13 = vector.broadcast %cst_14 : f32 to vector<2x8x8xf32>
    %14 = arith.cmpf ogt, %12, %13 : vector<2x8x8xf32>
    %15 = vector.extract_strided_slice %6 {offsets = [0, 0, 0], sizes = [2, 8, 16], strides = [1, 1, 1]} : vector<2x8x32xf32> to vector<2x8x16xf32>
    %16 = vector.extract_strided_slice %7 {offsets = [0, 0, 0], sizes = [2, 8, 16], strides = [1, 1, 1]} : vector<2x8x64xf32> to vector<2x8x16xf32>
    %17 = vector.extract_strided_slice %7 {offsets = [0, 0, 32], sizes = [2, 8, 16], strides = [1, 1, 1]} : vector<2x8x64xf32> to vector<2x8x16xf32>
    "tpu.trace_start"() <{level = 10 : i32, message = "bme,bne->bmn"}> : () -> ()
    %cst_15 = arith.constant dense<0.000000e+00> : vector<2x8x8xf32>
    %18 = tpu.matmul %15, %16, %cst_15 {dimension_numbers = #tpu.dot_dimension_numbers<[2], [2], [1], [1], [0, 0, 0, 1, 1, 1], [0], [0]>} : vector<2x8x16xf32>, vector<2x8x16xf32>, vector<2x8x8xf32> -> vector<2x8x8xf32>
    %cst_16 = arith.constant -1.000000e+30 : f32
    "tpu.trace_stop"() : () -> ()
    %19 = vector.broadcast %cst_16 : f32 to vector<2x8x8xf32>
    %20 = arith.select %14, %18, %19 : vector<2x8x8xi1>, vector<2x8x8xf32>
    %cst_17 = arith.constant dense<0xFF800000> : vector<2x8xf32>
    %21 = vector.multi_reduction <maximumf>, %20, %cst_17 [2] : vector<2x8x8xf32> to vector<2x8xf32>
    %22 = vector.shape_cast %21 : vector<2x8xf32> to vector<2x8x1xf32>
    %23 = vector.broadcast %22 : vector<2x8x1xf32> to vector<2x8x8xf32>
    %24 = arith.subf %20, %23 : vector<2x8x8xf32>
    %25 = math.exp %24 : vector<2x8x8xf32>
    %cst_18 = arith.constant dense<0.000000e+00> : vector<2x8xf32>
    %26 = vector.multi_reduction <add>, %25, %cst_18 [2] : vector<2x8x8xf32> to vector<2x8xf32>
    %27 = vector.shape_cast %26 : vector<2x8xf32> to vector<2x8x1xf32>
    %28 = vector.broadcast %27 : vector<2x8x1xf32> to vector<2x8x8xf32>
    %29 = arith.divf %25, %28 : vector<2x8x8xf32>
    "tpu.trace_start"() <{level = 10 : i32, message = "bmn,bne->bme"}> : () -> ()
    %cst_19 = arith.constant dense<0.000000e+00> : vector<2x8x16xf32>
    %30 = tpu.matmul %29, %17, %cst_19 {dimension_numbers = #tpu.dot_dimension_numbers<[2], [1], [1], [2], [0, 0, 0, 1, 1, 2], [0], [0]>} : vector<2x8x8xf32>, vector<2x8x16xf32>, vector<2x8x16xf32> -> vector<2x8x16xf32>
    "tpu.trace_stop"() : () -> ()
    %31 = vector.extract_strided_slice %6 {offsets = [0, 0, 16], sizes = [2, 8, 16], strides = [1, 1, 1]} : vector<2x8x32xf32> to vector<2x8x16xf32>
    %32 = vector.extract_strided_slice %7 {offsets = [0, 0, 16], sizes = [2, 8, 16], strides = [1, 1, 1]} : vector<2x8x64xf32> to vector<2x8x16xf32>
    %33 = vector.extract_strided_slice %7 {offsets = [0, 0, 48], sizes = [2, 8, 16], strides = [1, 1, 1]} : vector<2x8x64xf32> to vector<2x8x16xf32>
    "tpu.trace_start"() <{level = 10 : i32, message = "bme,bne->bmn"}> : () -> ()
    %cst_20 = arith.constant dense<0.000000e+00> : vector<2x8x8xf32>
    %34 = tpu.matmul %31, %32, %cst_20 {dimension_numbers = #tpu.dot_dimension_numbers<[2], [2], [1], [1], [0, 0, 0, 1, 1, 1], [0], [0]>} : vector<2x8x16xf32>, vector<2x8x16xf32>, vector<2x8x8xf32> -> vector<2x8x8xf32>
    %cst_21 = arith.constant -1.000000e+30 : f32
    "tpu.trace_stop"() : () -> ()
    %35 = vector.broadcast %cst_21 : f32 to vector<2x8x8xf32>
    %36 = arith.select %14, %34, %35 : vector<2x8x8xi1>, vector<2x8x8xf32>
    %cst_22 = arith.constant dense<0xFF800000> : vector<2x8xf32>
    %37 = vector.multi_reduction <maximumf>, %36, %cst_22 [2] : vector<2x8x8xf32> to vector<2x8xf32>
    %38 = vector.shape_cast %37 : vector<2x8xf32> to vector<2x8x1xf32>
    %39 = vector.broadcast %38 : vector<2x8x1xf32> to vector<2x8x8xf32>
    %40 = arith.subf %36, %39 : vector<2x8x8xf32>
    %41 = math.exp %40 : vector<2x8x8xf32>
    %cst_23 = arith.constant dense<0.000000e+00> : vector<2x8xf32>
    %42 = vector.multi_reduction <add>, %41, %cst_23 [2] : vector<2x8x8xf32> to vector<2x8xf32>
    %43 = vector.shape_cast %42 : vector<2x8xf32> to vector<2x8x1xf32>
    %44 = vector.broadcast %43 : vector<2x8x1xf32> to vector<2x8x8xf32>
    %45 = arith.divf %41, %44 : vector<2x8x8xf32>
    "tpu.trace_start"() <{level = 10 : i32, message = "bmn,bne->bme"}> : () -> ()
    %cst_24 = arith.constant dense<0.000000e+00> : vector<2x8x16xf32>
    %46 = tpu.matmul %45, %33, %cst_24 {dimension_numbers = #tpu.dot_dimension_numbers<[2], [1], [1], [2], [0, 0, 0, 1, 1, 2], [0], [0]>} : vector<2x8x8xf32>, vector<2x8x16xf32>, vector<2x8x16xf32> -> vector<2x8x16xf32>
    "tpu.trace_stop"() : () -> ()
    %47 = tpu.concatenate %30, %46 in 2 : vector<2x8x16xf32>, vector<2x8x16xf32> -> vector<2x8x32xf32>
    %48 = vector.shape_cast %47 : vector<2x8x32xf32> to vector<16x32xf32>
    %c0_25 = arith.constant 0 : index
    %c0_26 = arith.constant 0 : index
    %49 = vector.load %arg7[%c0_25, %c0_26] : memref<32x32xf32, #tpu.memory_space<vmem>>, vector<32x32xf32>
    %cst_27 = arith.constant dense<0.000000e+00> : vector<16x32xf32>
    %50 = tpu.matmul %48, %49, %cst_27 {dimension_numbers = #tpu.dot_dimension_numbers<[1], [0], [0], [1], [0, 0, 1, 1], [], []>} : vector<16x32xf32>, vector<32x32xf32>, vector<16x32xf32> -> vector<16x32xf32>
    %c0_28 = arith.constant 0 : index
    %c0_29 = arith.constant 0 : index
    %51 = vector.load %arg8[%c0_28, %c0_29] : memref<16x32xf32, #tpu.memory_space<vmem>>, vector<16x32xf32>
    tpu.vector_store %arg8[%c0_28, %c0_29], %50 {strides = array<i32>} : memref<16x32xf32, #tpu.memory_space<vmem>>, vector<16x32xf32>,
    return
  }
  func.func @transform_0(%arg0: i32) -> (i32, i32) {
    %c0_i32 = arith.constant 0 : i32
    %c0_i32_0 = arith.constant 0 : i32
    return %arg0, %c0_i32 : i32, i32
  }
  func.func @transform_1(%arg0: i32) -> (i32, i32) {
    %c0_i32 = arith.constant 0 : i32
    %c0_i32_0 = arith.constant 0 : i32
    return %arg0, %c0_i32 : i32, i32
  }
  func.func @transform_2(%arg0: i32) -> (i32, i32, i32) {
    %c0_i32 = arith.constant 0 : i32
    %c0_i32_0 = arith.constant 0 : i32
    %c0_i32_1 = arith.constant 0 : i32
    return %arg0, %c0_i32, %c0_i32_0 : i32, i32, i32
  }
  func.func @transform_3(%arg0: i32) -> (i32, i32, i32) {
    %c0_i32 = arith.constant 0 : i32
    %c0_i32_0 = arith.constant 0 : i32
    %c0_i32_1 = arith.constant 0 : i32
    return %arg0, %c0_i32, %c0_i32_0 : i32, i32, i32
  }
  func.func @transform_4(%arg0: i32) -> (i32, i32) {
    %c0_i32 = arith.constant 0 : i32
    %c0_i32_0 = arith.constant 0 : i32
    %c0_i32_1 = arith.constant 0 : i32
    return %c0_i32, %c0_i32_0 : i32, i32
  }
  func.func @transform_5(%arg0: i32) -> (i32, i32) {
    %c0_i32 = arith.constant 0 : i32
    %c0_i32_0 = arith.constant 0 : i32
    %c0_i32_1 = arith.constant 0 : i32
    return %c0_i32, %c0_i32_0 : i32, i32
  }
  func.func @transform_6(%arg0: i32) -> (i32, i32) {
    %c0_i32 = arith.constant 0 : i32
    %c0_i32_0 = arith.constant 0 : i32
    %c0_i32_1 = arith.constant 0 : i32
    return %c0_i32, %c0_i32_0 : i32, i32
  }
  func.func @transform_7(%arg0: i32) -> (i32, i32) {
    %c0_i32 = arith.constant 0 : i32
    %c0_i32_0 = arith.constant 0 : i32
    return %arg0, %c0_i32 : i32, i32
  }
}

</mosaic_0001>

<bundles_post_ra>
// kernel: tpu_custom_call.1
= control target key start
LH: loop header
LB: loop body
LE: loop exit
PB: predicated region body
PF: predicated region fallthrough
CT: control target
= control target key end

     0   :  { %12 = vsyncpa [#allocation3], 0  ;;  %s1667_s0 = inlined_call_operand.hbm [shape: f32[16,32], index: 0, kind: input, shape index: {}]   ;;  %s1668_s1 = inlined_call_operand.hbm [shape: f32[16,32], index: 1, kind: input, shape index: {}]   ;;  %s1669_s2 = inlined_call_operand.vmem [shape: f32[2,8,1], index: 2, kind: input, shape index: {}]   ;;  %s1670_s3 = inlined_call_operand.hbm [shape: f32[2,1,8], index: 3, kind: input, shape index: {}]   ;;  %s1671_s4 = inlined_call_operand.vmem [shape: f32[32,32], index: 4, kind: input, shape index: {}]   ;;  %s1672_s5 = inlined_call_operand.hbm [shape: f32[32,64], index: 5, kind: input, shape index: {}]   ;;  %s1673_s6 = inlined_call_operand.hbm [shape: f32[32,32], index: 6, kind: input, shape index: {}]   ;;  %s1674_s7 = inlined_call_operand.hbm [shape: f32[16,32], index: 7, kind: output, shape index: {}]  }
   0x1   :  { %13 = vsyncpa [#allocation6], 0 }
   0x2   :  { %14 = vsyncpa [#allocation9], 0 }
   0x3   :  { %15 = vsyncpa [#allocation4], 0  ;;  %s1402_s24 = smov [#allocation5]   ;;  %s1403_s26 = smov [#allocation8]  }
   0x4   :  { %s33_s25 = sshll.u32 %s1402_s24, 4  ;;  %s61_s27 = sshll.u32 %s1403_s26, 4  ;;  %s34_s25 = int_to_ptr.vmem [resolvable:$true] %s33_s25  ;;  %s1458_s27 = int_to_ptr.vmem [resolvable:$true] %s61_s27 }
   0x5   :  { %s1262_s30 = scalar_lea.hbm %s1668_s1, 256 }
   0x6   :  { %p1263_p0 = scmp.ne.s32.totalorder %s1668_s1, %s1262_s30  ;;  %p1266_p1 = scmp.lt.u32.totalorder %s1262_s30, %s1668_s1 }
   0x8   :  { %p1268_p2 = pnand %p1266_p1, %p1263_p0 }
   0xa   :  { %1271 = shalt.err (!%p1268_p2)
}
   0xb   :  { %s1272_s12 = scalar_lea.vmem %s34_s25, 256  ;;  %p1277_p4 = scmp.lt.s32.totalorder %s34_s25, %s34_s25 }
   0xc   :  { %p1273_p3 = scmp.ne.s32.totalorder %s34_s25, %s1272_s12  ;;  %p1278_p5 = scmp.lt.s32.totalorder %s1272_s12, %s1272_s12 }
   0xe   :  { %p1279_p6 = por %p1278_p5, %p1277_p4 }
  0x10   :  { %p1280_p7 = pnand %p1279_p6, %p1273_p3 }
  0x12   :  { %1283 = shalt.err (!%p1280_p7)
}
  0x13   :  { %s1404_s13 = smov 128   ;;  %s1405_s14 = smov 8  }
  0x14   :  { %39 = dma.hbm_to_vmem [thread:$0]  %s1668_s1, 256, %s34_s25, [#allocation6], %s1404_s13, %s1404_s13, %s1405_s14  }
  0x15   :  { %s1284_s19 = scalar_lea.hbm %s1672_s5, 512 }
  0x16   :  { %p1285_p8 = scmp.ne.s32.totalorder %s1672_s5, %s1284_s19  ;;  %p1288_p9 = scmp.lt.u32.totalorder %s1284_s19, %s1672_s5 }
  0x18   :  { %p1290_p10 = pnand %p1288_p9, %p1285_p8 }
  0x1a   :  { %1293 = shalt.err (!%p1290_p10)
}
  0x1b   :  { %s1294_s24 = scalar_lea.vmem %s1458_s27, 512  ;;  %p1299_p12 = scmp.lt.s32.totalorder %s1458_s27, %s1458_s27 }
  0x1c   :  { %p1295_p11 = scmp.ne.s32.totalorder %s1458_s27, %s1294_s24  ;;  %p1300_p13 = scmp.lt.s32.totalorder %s1294_s24, %s1294_s24 }
  0x1e   :  { %p1301_p0 = por %p1300_p13, %p1299_p12 }
  0x20   :  { %p1302_p1 = pnand %p1301_p0, %p1295_p11 }
  0x22   :  { %1305 = shalt.err (!%p1302_p1)
}
  0x23   :  { %67 = dma.hbm_to_vmem [thread:$0]  %s1672_s5, 512, %s1458_s27, [#allocation9], %s1404_s13, %s1404_s13, %s1405_s14  }
  0x24   :  { %s1406_s26 = smov [#allocation2]   ;;  %s1407_s29 = smov [#allocation7]  }
  0x25   :  { %s21_s28 = sshll.u32 %s1406_s26, 4  ;;  %s47_s30 = sshll.u32 %s1407_s29, 4  ;;  %s22_s28 = int_to_ptr.vmem [resolvable:$true] %s21_s28  ;;  %s1495_s30 = int_to_ptr.vmem [resolvable:$true] %s47_s30 }
  0x26   :  { %s1306_s10 = scalar_lea.hbm %s1667_s0, 256 }
  0x27   :  { %p1307_p2 = scmp.ne.s32.totalorder %s1667_s0, %s1306_s10  ;;  %p1310_p3 = scmp.lt.u32.totalorder %s1306_s10, %s1667_s0 }
  0x29   :  { %p1312_p4 = pnand %p1310_p3, %p1307_p2 }
  0x2b   :  { %1315 = shalt.err (!%p1312_p4)
}
  0x2c   :  { %s1316_s5 = scalar_lea.vmem %s22_s28, 256  ;;  %p1321_p6 = scmp.lt.s32.totalorder %s22_s28, %s22_s28 }
  0x2d   :  { %p1317_p5 = scmp.ne.s32.totalorder %s22_s28, %s1316_s5  ;;  %p1322_p7 = scmp.lt.s32.totalorder %s1316_s5, %s1316_s5 }
  0x2f   :  { %p1323_p8 = por %p1322_p7, %p1321_p6 }
  0x31   :  { %p1324_p9 = pnand %p1323_p8, %p1317_p5 }
  0x33   :  { %1327 = shalt.err (!%p1324_p9)
}
  0x34   :  { %27 = dma.hbm_to_vmem [thread:$0]  %s1667_s0, 256, %s22_s28, [#allocation3], %s1404_s13, %s1404_s13, %s1405_s14  }
  0x35   :  { %s1328_s20 = scalar_lea.hbm %s1670_s3, 32 }
  0x36   :  { %p1329_p10 = scmp.ne.s32.totalorder %s1670_s3, %s1328_s20  ;;  %p1332_p11 = scmp.lt.u32.totalorder %s1328_s20, %s1670_s3 }
  0x38   :  { %p1334_p12 = pnand %p1332_p11, %p1329_p10 }
  0x3a   :  { %1337 = shalt.err (!%p1334_p12)
}
  0x3b   :  { %s1338_s1 = scalar_lea.vmem %s1495_s30, 32  ;;  %p1343_p0 = scmp.lt.s32.totalorder %s1495_s30, %s1495_s30 }
  0x3c   :  { %p1339_p13 = scmp.ne.s32.totalorder %s1495_s30, %s1338_s1  ;;  %p1344_p1 = scmp.lt.s32.totalorder %s1338_s1, %s1338_s1 }
  0x3e   :  { %p1345_p2 = por %p1344_p1, %p1343_p0 }
  0x40   :  { %p1346_p3 = pnand %p1345_p2, %p1339_p13 }
  0x42   :  { %1349 = shalt.err (!%p1346_p3)
}
  0x43   :  { %s1408_s0 = smov 16   ;;  %s1409_s25 = smov 1  }
  0x44   :  { %53 = dma.hbm_to_vmem [thread:$0]  %s1670_s3, 32, %s1495_s30, [#allocation6], %s1408_s0, %s1408_s0, %s1409_s25  }
  0x45   :  { %s1410_s29 = smov [#allocation10]   ;;  %s1350_s11 = scalar_lea.hbm %s1673_s6, 512 }
  0x46   :  { %s73_s8 = sshll.u32 %s1410_s29, 4  ;;  %p1351_p4 = scmp.ne.s32.totalorder %s1673_s6, %s1350_s11  ;;  %s74_s8 = int_to_ptr.vmem [resolvable:$true] %s73_s8 }
  0x47   :  { %p1354_p5 = scmp.lt.u32.totalorder %s1350_s11, %s1673_s6 }
  0x49   :  { %p1356_p6 = pnand %p1354_p5, %p1351_p4 }
  0x4b   :  { %1359 = shalt.err (!%p1356_p6)
}
  0x4c   :  { %s1360_s27 = scalar_lea.vmem %s74_s8, 512  ;;  %p1365_p8 = scmp.lt.s32.totalorder %s74_s8, %s74_s8 }
  0x4d   :  { %p1361_p7 = scmp.ne.s32.totalorder %s74_s8, %s1360_s27  ;;  %p1366_p9 = scmp.lt.s32.totalorder %s1360_s27, %s1360_s27 }
  0x4f   :  { %p1367_p10 = por %p1366_p9, %p1365_p8 }
  0x51   :  { %p1368_p11 = pnand %p1367_p10, %p1361_p7 }
  0x53   :  { %1371 = shalt.err (!%p1368_p11)
}
  0x54   :  { %79 = dma.hbm_to_vmem [thread:$0]  %s1673_s6, 512, %s74_s8, [#allocation9], %s1404_s13, %s1404_s13, %s1405_s14  }
  0x55   :  { %1394 = dma.done.wait [#allocation3], 256  }
  0x56   :  { %1395 = vsyncadd [#allocation3], 4294967040 }
  0x57   :  { %1396 = dma.done.wait [#allocation6], 288  }
  0x58   :  { %1397 = vsyncadd [#allocation6], 4294967008 }
  0x59   :  { %1398 = dma.done.wait [#allocation9], 1024  }
  0x5a   :  { %1399 = vsyncadd [#allocation9], 4294966272  ;;  %v185_v0 = vld [vmem:[#allocation8] sm:$0xff]  ;;  %v186_v1 = vld [vmem:[#allocation8 + $0x8] sm:$0xff]  ;;  %vm101_vm0 = vcmask 261120   ;;  %v1411_v16 = vmov 0.0  }
  0x5b   :  { %v97_v2 = vld [vmem:[%s1671_s4] sm:$0xff]  ;;  %v1213_v3 = vpack.c.bf16 %v186_v1, %v185_v0  ;;  %v98_v4 = vld [vmem:[%s1671_s4 + $0x8] sm:$0xff]  ;;  %v187_v5 = vld [vmem:[#allocation8 + $0x10] sm:$0xff]  ;;  %vm1412_vm1 = vmmov 0   ;;  %v1413_v18 = vmov 0   ;;  %vm300_vm2 = vcmask 130048  }
  0x5c   :  { %v188_v6 = vld [vmem:[#allocation8 + $0x18] sm:$0xff]  ;;  %v1205_v7 = vpack.c.bf16 %v98_v4, %v97_v2  ;;  %v99_v9 = vld [vmem:[%s1671_s4 + $0x10] sm:$0xff]  ;;  %v96_v15 = vld [vmem:[#allocation2 + $0x8] sm:$0xff]  ;;  %1245 = vset.pattern.permute.xlu0 %v1413_v18  ;;  %vm455_vm4 = vcmask 64512   ;;  %s1415_s26 = smov 112   ;;  %s1416_s28 = smov 80  }
  0x5d   :  { %v1217_v8 = vpack.c.bf16 %v188_v6, %v187_v5  ;;  %v100_v10 = vld [vmem:[%s1671_s4 + $0x18] sm:$0xff]  ;;  %v183_v11 = vld [vmem:[#allocation5] sm:$0xff]  ;;  %1214 = vmatprep.subr.bf16.mxu1 %v1213_v3  ;;  %v95_v13 = vld [vmem:[#allocation2] sm:$0xff]  ;;  %s1417_s29 = smov [#allocation11]  }
  0x5e   :  { %v1209_v12 = vpack.c.bf16 %v100_v10, %v99_v9  ;;  %1151 = vmatprep.mubr.msk.f32.mxu1 %vm101_vm0, %v183_v11  ;;  %1216 = vmatpush3.bf16.msra.mxu1 %v1213_v3  ;;  %v184_v14 = vld [vmem:[#allocation5 + $0x8] sm:$0xff]  ;;  %v270_v17 = vld [vmem:[%s1669_s2] sm:$0xff]  ;;  %v271_v19 = vld [vmem:[%s1669_s2 + $0x8] sm:$0xff]  ;;  %s1414_s2 = smov 96   ;;  %s1064_s8 = sshll.u32 %s1417_s29, 4  ;;  %s1065_s8 = int_to_ptr.vmem [resolvable:$true] %s1064_s8 }
  0x5f   :  { %1206 = vmatprep.subr.bf16.mxu0 %v1205_v7  ;;  %1218 = vmatprep.subr.bf16.mxu1 %v1217_v8  ;;  %v1082_v24 = vld [vmem:[#allocation7] ss:$0 sm:$0xff]  ;;  %v1083_v27 = vld [vmem:[#allocation7 + $0x1] ss:$0 sm:$0xff]  ;;  %p1377_p13 = scmp.lt.s32.totalorder %s1065_s8, %s1065_s8 }
  0x60   :  { %1208 = vmatpush3.bf16.msra.mxu0 %v1205_v7  ;;  %1140 = vmatprep.mubr.msk.f32.mxu0 %vm101_vm0, %v95_v13 }
  0x61   :  { %1210 = vmatprep.subr.bf16.mxu0 %v1209_v12  ;;  %276 = vperm.xlu0 %1245, %v270_v17  }
  0x62   :  { %1220 = vmatpush3.bf16.msra.mxu1 %v1217_v8 }
  0x63   :  { %1154 = vmatprep.subr.mxu1 %v1411_v16 }
  0x64   :  { %1212 = vmatpush3.bf16.msra.mxu0 %v1209_v12 }
  0x65   :  { %1152 = vmatmul.mubr.msk.f32.vlgmr.msra.gmra.mrb[0].mxu1 %vm101_vm0, %v184_v14  ;;  %1164 = vmatprep.subr.mxu0 %v1411_v16 }
  0x66   :  { %1156 = vmatprep.mubr.msk.f32.mxu1 %vm1412_vm1, %v1411_v16  ;;  %281 = vperm.xlu0 %1245, %v271_v19  }
  0x67   :  { %1141 = vmatmul.mubr.msk.f32.vlgmr.msra.gmra.mrb[0].mxu0 %vm101_vm0, %v96_v15 }
  0x68   :  { %1166 = vmatprep.mubr.msk.f32.mxu0 %vm1412_vm1, %v1411_v16 }
  0xe0   :  { %v277_v25 = vpop.permute.xlu0 %276 }
  0xe1   :  { %v1590_v26 = vmul.f32 %v1082_v24, %v277_v25 }
  0xe3   :  { %vm298_vm3 = vcmp.gt.f32.partialorder %v1590_v26, 0.5 }
  0xe5   :  { %v282_v28 = vpop.permute.xlu0 %281 }
  0xe6   :  { %v1593_v29 = vmul.f32 %v1083_v27, %v282_v28  ;;  %v972_v27 = vld [vmem:[#allocation10] sm:$0xff]  ;;  %v973_v28 = vld [vmem:[#allocation10 + $0x8] sm:$0xff] }
  0xe8   :  { %vm299_vm5 = vcmp.gt.f32.partialorder %v1593_v29, 0.5  ;;  %v1221_v29 = vpack.c.bf16 %v973_v28, %v972_v27 }
 0x138   :  { %v1574_v20 = vpop.f32.mrb[0].mxu1 }
 0x139   :  { %v1576_v21 = vpop.f32.mrb[1].mxu1 }
 0x13a   :  { %v1142_v22 = vpop.f32.mrb[0].mxu0  ;;  %1155 = vmatpush3.xpose.msk.msra.mxu1 %vm300_vm2, %v1576_v21 }
 0x13b   :  { %v174_v23 = vpop.f32.mrb[1].mxu0  ;;  %1159 = vmatprep.subr.mxu1 %v1411_v16 }
 0x13d   :  { %1157 = vmatmul.mubr.msk.f32.vlgmr.msra.gmra.mrb[2].mxu1 %vm300_vm2, %v174_v23 }
 0x13e   :  { %1160 = vmatpush3.xpose.msk.msra.mxu1 %vm300_vm2, %v1574_v20  ;;  %1161 = vmatprep.mubr.msk.f32.mxu1 %vm1412_vm1, %v1411_v16 }
 0x13f   :  { %1169 = vmatprep.subr.mxu1 %v1411_v16 }
 0x141   :  { %1162 = vmatmul.mubr.msk.f32.vlgmr.msra.gmra.mrb[4].mxu1 %vm300_vm2, %v1142_v22 }
 0x142   :  { %1171 = vmatprep.mubr.msk.f32.mxu1 %vm1412_vm1, %v1411_v16 }
 0x210   :  { %v373_v30 = vpop.f32.mrb[2].mxu1 }
 0x211   :  { %v453_v31 = vsel %vm298_vm3, %v373_v30, -1e+30  ;;  %v1158_v32 = vpop.f32.mrb[3].mxu1  ;;  %v975_v30 = vld [vmem:[#allocation10 + $0x18] sm:$0xff] }
 0x212   :  { %v456_v33 = vsel %vm455_vm4, %v453_v31, -inf }
 0x213   :  { %457 = vmax.xlane.f32.xlu1 %v456_v33 }
 0x214   :  { %v449_v34 = vpop.f32.mrb[4].mxu1 }
 0x215   :  { %v454_v35 = vsel %vm299_vm5, %v449_v34, -1e+30  ;;  %v1163_v36 = vpop.f32.mrb[5].mxu1 }
 0x216   :  { %v459_v37 = vsel %vm455_vm4, %v454_v35, -inf }
 0x217   :  { %460 = vmax.xlane.f32.xlu1 %v459_v37 }
 0x228   :  { %478 = vrot.lane.b32.xlu1 %v1576_v21, %s1414_s2 }
 0x22c   :  { %554 = vrot.lane.b32.xlu1 %v1574_v20, %s1414_s2 }
 0x230   :  { %632 = vrot.lane.b32.xlu1 %v1576_v21, %s1415_s26 }
 0x234   :  { %710 = vrot.lane.b32.xlu1 %v1574_v20, %s1415_s26 }
 0x2a0   :  { %v458_v38 = vpop.xlane.xlu1 %457 }
 0x2a1   :  { %v462_v39 = vsub.f32 %v453_v31, %v458_v38 }
 0x2a3   :  { %v464_v40 = vmul.f32 1.442695, %v462_v39 }
 0x2a4   :  { %v461_v41 = vpop.xlane.xlu1 %460 }
 0x2a5   :  { %1246 = vpow2.f32 %v464_v40  ;;  %v463_v42 = vsub.f32 %v454_v35, %v461_v41 }
 0x2a7   :  { %v466_v43 = vmul.f32 1.442695, %v463_v42 }
 0x2a8   :  { %v479_v44 = vpop.permute.xlu1 %478 }
 0x2a9   :  { %1248 = vpow2.f32 %v466_v43  ;;  %1165 = vmatpush3.msra.mxu0 %v479_v44 }
 0x2aa   :  { %1174 = vmatprep.subr.mxu0 %v1411_v16 }
 0x2ac   :  { %v555_v45 = vpop.permute.xlu1 %554 }
 0x2ad   :  { %1170 = vmatpush3.msra.mxu1 %v555_v45 }
 0x2ae   :  { %1179 = vmatprep.subr.mxu1 %v1411_v16 }
 0x2af   :  { %v1247_v46 = vpop.eup %1246 }
 0x2b0   :  { %v468_v47 = vsel %vm455_vm4, %v1247_v46, 0.0  ;;  %v633_v50 = vpop.permute.xlu1 %632 }
 0x2b1   :  { %469 = vadd.xlane.f32.xlu0 %v468_v47 }
 0x2b3   :  { %v1249_v48 = vpop.eup %1248 }
 0x2b4   :  { %v471_v49 = vsel %vm455_vm4, %v1249_v48, 0.0  ;;  %v711_v51 = vpop.permute.xlu1 %710 }
 0x2b5   :  { %472 = vadd.xlane.f32.xlu1 %v471_v49 }
 0x2c6   :  { %708 = vrot.lane.b32.xlu1 %v1142_v22, %s1415_s26 }
 0x2c7   :  { %630 = vrot.lane.b32.xlu0 %v174_v23, %s1415_s26 }
 0x33e   :  { %v470_v52 = vpop.xlane.xlu0 %469 }
 0x33f   :  { %1250 = vrcp.f32 %v470_v52 }
 0x342   :  { %v473_v53 = vpop.xlane.xlu1 %472  ;;  %v631_v58 = vpop.permute.xlu0 %630 }
 0x343   :  { %1252 = vrcp.f32 %v473_v53 }
 0x346   :  { %v709_v59 = vpop.permute.xlu1 %708 }
 0x349   :  { %v1251_v54 = vpop.eup %1250 }
 0x34a   :  { %v475_v55 = vmul.f32 %v1251_v54, %v1247_v46 }
 0x34c   :  { %1167 = vmatmul.mubr.msk.f32.vlgmr.msra.gmra.mrb[2].mxu0 %vm455_vm4, %v475_v55 }
 0x34d   :  { %v1253_v56 = vpop.eup %1252  ;;  %1175 = vmatpush3.xpose.msk.msra.mxu0 %vm300_vm2, %v633_v50  ;;  %1176 = vmatprep.mubr.msk.f32.mxu0 %vm1412_vm1, %v1411_v16 }
 0x34e   :  { %v477_v57 = vmul.f32 %v1253_v56, %v1249_v48  ;;  %1184 = vmatprep.subr.mxu0 %v1411_v16 }
 0x350   :  { %1172 = vmatmul.mubr.msk.f32.vlgmr.msra.gmra.mrb[6].mxu1 %vm455_vm4, %v477_v57  ;;  %1177 = vmatmul.mubr.msk.f32.vlgmr.msra.gmra.mrb[4].mxu0 %vm300_vm2, %v631_v58 }
 0x351   :  { %1180 = vmatpush3.xpose.msk.msra.mxu1 %vm300_vm2, %v711_v51  ;;  %1181 = vmatprep.mubr.msk.f32.mxu1 %vm1412_vm1, %v1411_v16 }
 0x352   :  { %1189 = vmatprep.subr.mxu1 %v1411_v16  ;;  %1186 = vmatprep.mubr.msk.f32.mxu0 %vm1412_vm1, %v1411_v16 }
 0x354   :  { %1182 = vmatmul.mubr.msk.f32.vlgmr.msra.gmra.mrb[8].mxu1 %vm300_vm2, %v709_v59 }
 0x355   :  { %1191 = vmatprep.mubr.msk.f32.mxu1 %vm1412_vm1, %v1411_v16 }
 0x41f   :  { %v1626_v60 = vpop.f32.mrb[2].mxu0 }
 0x420   :  { %v1168_v61 = vpop.f32.mrb[3].mxu0 }
 0x423   :  { %v1628_v62 = vpop.f32.mrb[6].mxu1  ;;  %v704_v63 = vpop.f32.mrb[4].mxu0 }
 0x424   :  { %v786_v0 = vsel %vm298_vm3, %v704_v63, -1e+30  ;;  %v1173_v1 = vpop.f32.mrb[7].mxu1  ;;  %v1178_v2 = vpop.f32.mrb[5].mxu0 }
 0x425   :  { %v788_v3 = vsel %vm455_vm4, %v786_v0, -inf }
 0x426   :  { %789 = vmax.xlane.f32.xlu1 %v788_v3 }
 0x427   :  { %v782_v4 = vpop.f32.mrb[8].mxu1 }
 0x428   :  { %v787_v5 = vsel %vm299_vm5, %v782_v4, -1e+30  ;;  %v1183_v6 = vpop.f32.mrb[9].mxu1 }
 0x429   :  { %v791_v7 = vsel %vm455_vm4, %v787_v5, -inf }
 0x42a   :  { %792 = vmax.xlane.f32.xlu0 %v791_v7 }
 0x440   :  { %886 = vrot.lane.b32.xlu0 %v1574_v20, %s1416_s28 }
 0x4b3   :  { %v790_v8 = vpop.xlane.xlu1 %789 }
 0x4b4   :  { %v794_v9 = vsub.f32 %v786_v0, %v790_v8 }
 0x4b6   :  { %v796_v10 = vmul.f32 1.442695, %v794_v9 }
 0x4b7   :  { %v793_v11 = vpop.xlane.xlu0 %792 }
 0x4b8   :  { %1254 = vpow2.f32 %v796_v10  ;;  %v795_v12 = vsub.f32 %v787_v5, %v793_v11 }
 0x4ba   :  { %v798_v13 = vmul.f32 1.442695, %v795_v12 }
 0x4bb   :  { %v887_v14 = vpop.permute.xlu0 %886 }
 0x4bc   :  { %1256 = vpow2.f32 %v798_v13  ;;  %1190 = vmatpush3.msra.mxu1 %v887_v14 }
 0x4c2   :  { %v1255_v15 = vpop.eup %1254 }
 0x4c3   :  { %v800_v16 = vsel %vm455_vm4, %v1255_v15, 0.0 }
 0x4c4   :  { %801 = vadd.xlane.f32.xlu1 %v800_v16 }
 0x4c6   :  { %v1257_v17 = vpop.eup %1256 }
 0x4c7   :  { %v803_v18 = vsel %vm455_vm4, %v1257_v17, 0.0 }
 0x4c8   :  { %804 = vadd.xlane.f32.xlu1 %v803_v18 }
 0x4d9   :  { %810 = vrot.lane.b32.xlu1 %v1576_v21, %s1416_s28  ;;  %v974_v21 = vld [vmem:[#allocation10 + $0x10] sm:$0xff] }
 0x4da   :  { %v1225_v31 = vpack.c.bf16 %v975_v30, %v974_v21 }
 0x551   :  { %v802_v19 = vpop.xlane.xlu1 %801 }
 0x552   :  { %1258 = vrcp.f32 %v802_v19 }
 0x555   :  { %v805_v20 = vpop.xlane.xlu1 %804 }
 0x556   :  { %1260 = vrcp.f32 %v805_v20 }
 0x559   :  { %v811_v22 = vpop.permute.xlu1 %810 }
 0x55a   :  { %1185 = vmatpush3.msra.mxu0 %v811_v22 }
 0x55b   :  { %1222 = vmatprep.subr.bf16.mxu0 %v1221_v29 }
 0x55c   :  { %v1259_v23 = vpop.eup %1258 }
 0x55d   :  { %v807_v24 = vmul.f32 %v1259_v23, %v1255_v15 }
 0x55f   :  { %1187 = vmatmul.mubr.msk.f32.vlgmr.msra.gmra.mrb[6].mxu0 %vm455_vm4, %v807_v24 }
 0x560   :  { %v1261_v25 = vpop.eup %1260  ;;  %1224 = vmatpush3.bf16.msra.mxu0 %v1221_v29 }
 0x561   :  { %v809_v26 = vmul.f32 %v1261_v25, %v1257_v17  ;;  %1226 = vmatprep.subr.bf16.mxu0 %v1225_v31 }
 0x563   :  { %1192 = vmatmul.mubr.msk.f32.vlgmr.msra.gmra.mrb[10].mxu1 %vm455_vm4, %v809_v26 }
 0x564   :  { %1228 = vmatpush3.bf16.msra.mxu0 %v1225_v31 }
 0x632   :  { %v882_v32 = vpop.f32.mrb[6].mxu0 }
 0x633   :  { %964 = vrot.lane.b32.xlu1 %v882_v32, %s1408_s0  ;;  %v1188_v33 = vpop.f32.mrb[7].mxu0 }
 0x636   :  { %v958_v34 = vpop.f32.mrb[10].mxu1 }
 0x637   :  { %966 = vrot.lane.b32.xlu1 %v958_v34, %s1408_s0  ;;  %v1193_v35 = vpop.f32.mrb[11].mxu1  ;;  %s1372_s0 = scalar_lea.vmem %s1065_s8, 256 }
 0x638   :  { %p1373_p12 = scmp.ne.s32.totalorder %s1065_s8, %s1372_s0  ;;  %p1378_p0 = scmp.lt.s32.totalorder %s1372_s0, %s1372_s0 }
 0x63a   :  { %p1379_p1 = por %p1378_p0, %p1377_p13 }
 0x63c   :  { %p1380_p2 = pnand %p1379_p1, %p1373_p12 }
 0x6a5   :  { %v965_v36 = vpop.permute.xlu1 %964 }
 0x6a6   :  { %v970_v37 = vsel %vm300_vm2, %v1626_v60, %v965_v36 }
 0x6a7   :  { %1202 = vmatprep.mubr.msk.f32.mxu0 %vm101_vm0, %v970_v37 }
 0x6a9   :  { %v967_v38 = vpop.permute.xlu1 %966 }
 0x6aa   :  { %v971_v39 = vsel %vm300_vm2, %v1628_v62, %v967_v38 }
 0x6ab   :  { %1203 = vmatmul.mubr.msk.f32.vlgmr.msra.gmra.mrb[8].mxu0 %vm101_vm0, %v971_v39 }
 0x77e   :  { %v1204_v40 = vpop.f32.mrb[8].mxu0 }
 0x77f   :  { %1058 = vst.msk [vmem:[#allocation11 + $0x8] sm:$0xff] %vm101_vm0, %v1204_v40  ;;  %v1048_v41 = vpop.f32.mrb[9].mxu0 }
 0x780   :  { %1057 = vst.msk [vmem:[#allocation11] sm:$0xff] %vm101_vm0, %v1048_v41 }
 0x781   :  { %1383 = shalt.err (!%p1380_p2)
}
 0x782   :  { %s1384_s11 = scalar_lea.hbm %s1674_s7, 256 }
 0x783   :  { %p1385_p3 = scmp.ne.s32.totalorder %s1674_s7, %s1384_s11  ;;  %p1388_p4 = scmp.lt.u32.totalorder %s1384_s11, %s1674_s7 }
 0x785   :  { %p1390_p5 = pnand %p1388_p4, %p1385_p3 }
 0x787   :  { %1393 = shalt.err (!%p1390_p5)
}
 0x788   :  { %1070 = dma.vmem_to_hbm [thread:$0]  %s1065_s8, 256, %s1674_s7, [#allocation4], %s1404_s13, %s1404_s13, %s1405_s14  }
 0x789   :  { %1400 = dma.done.wait [#allocation4], 256  }
 0x78a   :  { %1401 = vsyncadd [#allocation4], 4294967040 }
 0x78b   :  { %1074 = vsyncpa [#allocation3], 1 }
 0x78c   :  { %1075 = vsyncpa [#allocation6], 1 }
 0x78d   :  { %1076 = vsyncpa [#allocation9], 1 }
 0x78e   :  { %1077 = vsyncpa [#allocation4], 1 }

</bundles_post_ra>
